<compile_context>
chip_gen: v5e
topology: v5e:2x2
jax: 0.10.0
libtpu: 0.0.40
codegen_flags: <defaults>
</compile_context>

<pallas_src>
import jax
import jax.numpy as jnp
from jax.experimental import pallas as pl
from jax.experimental.pallas import tpu as pltpu


def simple_nn_kernel(x_ref, w1_ref, b1_ref, w2_ref, b2_ref, o_ref):
    # x: (TB, F), w1: (F, H), b1: (1, H), w2: (H, 1), b2: (1,) in SMEM,
    # o: (TB, 1).
    h = jnp.dot(x_ref[...], w1_ref[...], preferred_element_type=jnp.float32)
    h = jnp.maximum(h + b1_ref[...].astype(jnp.float32), 0.0)   # bias + ReLU on VPU
    # Second linear (out_features=1) as a second MXU dot -> (TB, 1); avoids the
    # cross-lane XLU reduce + relayout of the previous version.
    y = jnp.dot(h, w2_ref[...].astype(jnp.float32),
                preferred_element_type=jnp.float32)
    o_ref[...] = (y + b2_ref[0]).astype(o_ref.dtype)


def _round_up(x, m):
    return ((x + m - 1) // m) * m


def simple_nn_forward(x, w1, b1, w2, b2, *, block_batch=8192):
    """y = relu(x @ w1 + b1) @ w2 + b2 with w1:(F,H), b1:(1,H), w2:(H,1), b2:(1,1)."""
    B, F = x.shape
    H = w1.shape[1]

    # Batch tile: keep it large (amortize ~600-cycle per-step overhead) but
    # 128-aligned on the sublane axis; never larger than (rounded-up) B.
    TB = min(_round_up(block_batch, 128), _round_up(B, 128))
    if B > 256:
        # Keep at least 2 grid steps so v7x's two TensorCores both get work.
        TB = min(TB, _round_up(pl.cdiv(B, 2), 128))
    G = pl.cdiv(B, TB)  # last block may be ragged; Pallas masks it.

    b2_s = jnp.reshape(b2, (1,))       # scalar, lives in SMEM

    # VMEM budget: x tile, (TB,1) out tile and the h temp are all lane-padded
    # to 128 and (inputs/outputs) double-buffered -> ~5 * TB * 512 B at f32.
    vmem_need = 5 * TB * 128 * 4 + (1 << 20)
    vmem_limit = int(min(max(vmem_need, 32 << 20), 48 << 20))

    flops = 2 * B * F * H + 2 * B * H + 2 * B * H + B
    bytes_accessed = (x.dtype.itemsize * B * F
                      + w1.dtype.itemsize * F * H
                      + 4 * (2 * H + 1)
                      + x.dtype.itemsize * B)
    cost = pl.CostEstimate(flops=flops, transcendentals=0,
                           bytes_accessed=bytes_accessed)

    out = pl.pallas_call(
        simple_nn_kernel,
        out_shape=jax.ShapeDtypeStruct((B, 1), x.dtype),
        grid=(G,),
        in_specs=[
            # x streams tile-by-tile over the batch grid axis (pipelined DMA).
            pl.BlockSpec((TB, F), lambda i: (i, 0)),
            # Weights / biases are tiny full-array blocks, VMEM-resident.
            pl.BlockSpec((F, H), lambda i: (0, 0)),
            pl.BlockSpec((1, H), lambda i: (0, 0)),
            pl.BlockSpec((H, 1), lambda i: (0, 0)),
            # b2 scalar via SMEM (no padded VMEM tile, no extra DMA per step).
            pl.BlockSpec(memory_space=pltpu.MemorySpace.SMEM),
        ],
        out_specs=pl.BlockSpec((TB, 1), lambda i: (i, 0)),
        compiler_params=pltpu.CompilerParams(
            # Batch tiles are independent -> "parallel" lets v7x shard the grid
            # across its 2 TensorCores (no effect on single-TC v5e/v6e).
            dimension_semantics=("parallel",),
            vmem_limit_bytes=vmem_limit,
        ),
        cost_estimate=cost,
    )(x, w1, b1, w2, b2_s)

    return out


def init_params(key, input_size, hidden_size=10, dtype=jnp.float32):
    """Deterministic init mimicking nn.Linear's uniform(-1/sqrt(fan_in), 1/sqrt(fan_in))."""
    k1, k2, k3, k4 = jax.random.split(key, 4)
    lim1 = 1.0 / jnp.sqrt(input_size)
    lim2 = 1.0 / jnp.sqrt(hidden_size)
    # Stored already transposed relative to PyTorch: (in_features, out_features)
    w1 = jax.random.uniform(k1, (input_size, hidden_size), dtype, -lim1, lim1)
    b1 = jax.random.uniform(k2, (1, hidden_size), dtype, -lim1, lim1)
    w2 = jax.random.uniform(k3, (hidden_size, 1), dtype, -lim2, lim2)
    b2 = jax.random.uniform(k4, (1, 1), dtype, -lim2, lim2)
    return w1, b1, w2, b2


if __name__ == "__main__":
    key = jax.random.PRNGKey(0)
    kx, kp, kx2 = jax.random.split(key, 3)

    B, INPUT_SIZE, HIDDEN = 8, 32, 10
    w1, b1, w2, b2 = init_params(kp, INPUT_SIZE, HIDDEN)

    # Small aligned case.
    x = jax.random.normal(kx, (B, INPUT_SIZE), jnp.float32)
    out = jax.block_until_ready(simple_nn_forward(x, w1, b1, w2, b2))
    ref = jnp.maximum(x @ w1 + b1, 0.0) @ w2 + b2
    assert out.shape == (B, 1)
    assert jnp.allclose(out, ref, atol=1e-5, rtol=1e-5)

    # Larger, non-128-aligned batch: exercises multi-step grid + ragged last block.
    B2 = 777
    x2 = jax.random.normal(kx2, (B2, INPUT_SIZE), jnp.float32)
    out2 = jax.block_until_ready(
        simple_nn_forward(x2, w1, b1, w2, b2, block_batch=256))
    ref2 = jnp.maximum(x2 @ w1 + b1, 0.0) @ w2 + b2
    assert out2.shape == (B2, 1)
    assert jnp.allclose(out2, ref2, atol=1e-5, rtol=1e-5)

    print("KERNEL_OK")
</pallas_src>

<mosaic_0001>
module attributes {stable_mosaic.version = 11 : i64} {
  func.func @simple_nn_kernel(%arg0: i32, %arg1: memref<128x32xf32, #tpu.memory_space<vmem>>, %arg2: memref<32x10xf32, #tpu.memory_space<vmem>>, %arg3: memref<1x10xf32, #tpu.memory_space<vmem>>, %arg4: memref<10x1xf32, #tpu.memory_space<vmem>>, %arg5: memref<1xf32, #tpu.memory_space<smem>>, %arg6: memref<128x1xf32, #tpu.memory_space<vmem>>) attributes {dimension_semantics = [#tpu.dimension_semantics<parallel>], iteration_bounds = array<i64: 1>, scalar_prefetch = 0 : i64, scratch_operands = 0 : i64, tpu.core_type = #tpu.core_type<tc>, window_params = [{transform_indices = @transform_0, window_bounds = array<i64: 128, 32>}, {pipeline_mode = #tpu.pipeline_mode<synchronous>, transform_indices = @transform_1, window_bounds = array<i64: 32, 10>}, {pipeline_mode = #tpu.pipeline_mode<synchronous>, transform_indices = @transform_2, window_bounds = array<i64: 1, 10>}, {pipeline_mode = #tpu.pipeline_mode<synchronous>, transform_indices = @transform_3, window_bounds = array<i64: 10, 1>}, {transform_indices = @transform_4, window_bounds = array<i64: 1>}, {transform_indices = @transform_5, window_bounds = array<i64: 128, 1>}]} {
    %c0 = arith.constant 0 : index
    %c0_0 = arith.constant 0 : index
    %0 = vector.load %arg1[%c0, %c0_0] : memref<128x32xf32, #tpu.memory_space<vmem>>, vector<128x32xf32>
    %c0_1 = arith.constant 0 : index
    %c0_2 = arith.constant 0 : index
    %1 = vector.load %arg2[%c0_1, %c0_2] : memref<32x10xf32, #tpu.memory_space<vmem>>, vector<32x10xf32>
    %cst = arith.constant dense<0.000000e+00> : vector<128x10xf32>
    %2 = tpu.matmul %0, %1, %cst {dimension_numbers = #tpu.dot_dimension_numbers<[1], [0], [0], [1], [0, 0, 1, 1], [], []>} : vector<128x32xf32>, vector<32x10xf32>, vector<128x10xf32> -> vector<128x10xf32>
    %c0_3 = arith.constant 0 : index
    %c0_4 = arith.constant 0 : index
    %3 = vector.load %arg3[%c0_3, %c0_4] : memref<1x10xf32, #tpu.memory_space<vmem>>, vector<1x10xf32>
    %4 = vector.broadcast %3 : vector<1x10xf32> to vector<128x10xf32>
    %5 = arith.addf %2, %4 : vector<128x10xf32>
    %cst_5 = arith.constant 0.000000e+00 : f32
    %6 = vector.broadcast %cst_5 : f32 to vector<128x10xf32>
    %7 = arith.maximumf %5, %6 : vector<128x10xf32>
    %c0_6 = arith.constant 0 : index
    %c0_7 = arith.constant 0 : index
    %8 = vector.load %arg4[%c0_6, %c0_7] : memref<10x1xf32, #tpu.memory_space<vmem>>, vector<10x1xf32>
    %cst_8 = arith.constant dense<0.000000e+00> : vector<128x1xf32>
    %9 = tpu.matmul %7, %8, %cst_8 {dimension_numbers = #tpu.dot_dimension_numbers<[1], [0], [0], [1], [0, 0, 1, 1], [], []>} : vector<128x10xf32>, vector<10x1xf32>, vector<128x1xf32> -> vector<128x1xf32>
    %c0_9 = arith.constant 0 : index
    %10 = memref.load %arg5[%c0_9] : memref<1xf32, #tpu.memory_space<smem>>
    %11 = vector.broadcast %10 : f32 to vector<128x1xf32>
    %12 = arith.addf %9, %11 : vector<128x1xf32>
    %c0_10 = arith.constant 0 : index
    %c0_11 = arith.constant 0 : index
    %13 = vector.load %arg6[%c0_10, %c0_11] : memref<128x1xf32, #tpu.memory_space<vmem>>, vector<128x1xf32>
    tpu.vector_store %arg6[%c0_10, %c0_11], %12 {strides = array<i32>} : memref<128x1xf32, #tpu.memory_space<vmem>>, vector<128x1xf32>,
    return
  }
  func.func @transform_0(%arg0: i32) -> (i32, i32) {
    %c0_i32 = arith.constant 0 : i32
    %c0_i32_0 = arith.constant 0 : i32
    return %arg0, %c0_i32 : i32, i32
  }
  func.func @transform_1(%arg0: i32) -> (i32, i32) {
    %c0_i32 = arith.constant 0 : i32
    %c0_i32_0 = arith.constant 0 : i32
    %c0_i32_1 = arith.constant 0 : i32
    return %c0_i32, %c0_i32_0 : i32, i32
  }
  func.func @transform_2(%arg0: i32) -> (i32, i32) {
    %c0_i32 = arith.constant 0 : i32
    %c0_i32_0 = arith.constant 0 : i32
    %c0_i32_1 = arith.constant 0 : i32
    return %c0_i32, %c0_i32_0 : i32, i32
  }
  func.func @transform_3(%arg0: i32) -> (i32, i32) {
    %c0_i32 = arith.constant 0 : i32
    %c0_i32_0 = arith.constant 0 : i32
    %c0_i32_1 = arith.constant 0 : i32
    return %c0_i32, %c0_i32_0 : i32, i32
  }
  func.func @transform_4(%arg0: i32) -> i32 {
    %c0_i32 = arith.constant 0 : i32
    %c0_i32_0 = arith.constant 0 : i32
    return %c0_i32 : i32
  }
  func.func @transform_5(%arg0: i32) -> (i32, i32) {
    %c0_i32 = arith.constant 0 : i32
    %c0_i32_0 = arith.constant 0 : i32
    return %arg0, %c0_i32 : i32, i32
  }
}

</mosaic_0001>

<bundles_post_ra>
// kernel: tpu_custom_call.1
= control target key start
LH: loop header
LB: loop body
LE: loop exit
PB: predicated region body
PF: predicated region fallthrough
CT: control target
= control target key end

     0   :  { %vm45_vm0 = vcmask 261120   ;;  %vm228_vm1 = vcmask 1041408   ;;  %vm179_vm2 = vcmask 80896   ;;  %vm297_vm3 = vcmask 7168   ;;  %s532_s0 = inlined_call_operand.vmem [shape: f32[8,32], index: 0, kind: input, shape index: {}]   ;;  %s533_s1 = inlined_call_operand.vmem [shape: f32[32,10], index: 1, kind: input, shape index: {}]   ;;  %s534_s2 = inlined_call_operand.vmem [shape: f32[1,10], index: 2, kind: input, shape index: {}]   ;;  %s535_s3 = inlined_call_operand.vmem [shape: f32[10,1], index: 3, kind: input, shape index: {}]   ;;  %s536_s4 = inlined_call_operand.<no memory space> [shape: f32[1], index: 4, kind: input, shape index: {}]   ;;  %s537_s5 = inlined_call_operand.vmem [shape: f32[8,1], index: 5, kind: output, shape index: {}]  }
   0x1   :  { %v40_v0 = vld [vmem:[%s533_s1 + $0x18] sm:$0xff]  ;;  %v39_v1 = vld [vmem:[%s533_s1 + $0x10] sm:$0xff]  ;;  %v38_v2 = vld [vmem:[%s533_s1 + $0x8] sm:$0xff] }
   0x2   :  { %106 = vmatpush.msra.mxu0 %v40_v0  ;;  %388 = vmatpush.msra.mxu2 %v40_v0  ;;  %v37_v3 = vld [vmem:[%s533_s1] sm:$0xff]  ;;  %v22_v6 = vld [vmem:[%s532_s0 + $0x8] sm:$0xff]  ;;  %v23_v8 = vld [vmem:[%s532_s0 + $0x10] sm:$0xff] }
   0x3   :  { %v21_v4 = vld [vmem:[%s532_s0] sm:$0xff]  ;;  %v30_v7 = vld [vmem:[%s532_s0 + $0x48] sm:$0xff]  ;;  %v31_v9 = vld [vmem:[%s532_s0 + $0x50] sm:$0xff] }
   0x4   :  { %107 = vmatpush.msra.mxu0 %v39_v1  ;;  %389 = vmatpush.msra.mxu2 %v39_v1  ;;  %v29_v5 = vld [vmem:[%s532_s0 + $0x40] sm:$0xff]  ;;  %v24_v10 = vld [vmem:[%s532_s0 + $0x18] sm:$0xff]  ;;  %v26_v14 = vld [vmem:[%s532_s0 + $0x28] sm:$0xff] }
   0x5   :  { %v32_v11 = vld [vmem:[%s532_s0 + $0x58] sm:$0xff]  ;;  %v25_v12 = vld [vmem:[%s532_s0 + $0x20] sm:$0xff]  ;;  %v34_v15 = vld [vmem:[%s532_s0 + $0x68] sm:$0xff] }
   0x6   :  { %108 = vmatpush.msra.mxu0 %v38_v2  ;;  %390 = vmatpush.msra.mxu2 %v38_v2  ;;  %v33_v13 = vld [vmem:[%s532_s0 + $0x60] sm:$0xff]  ;;  %v27_v16 = vld [vmem:[%s532_s0 + $0x30] sm:$0xff]  ;;  %v28_v18 = vld [vmem:[%s532_s0 + $0x38] sm:$0xff] }
   0x7   :  { %v35_v17 = vld [vmem:[%s532_s0 + $0x70] sm:$0xff]  ;;  %v36_v19 = vld [vmem:[%s532_s0 + $0x78] sm:$0xff]  ;;  %v176_v20 = vld [vmem:[%s535_s3 + $0x8] sm:$0x3] }
   0x8   :  { %109 = vmatpush.msra.mxu0 %v37_v3  ;;  %391 = vmatpush.msra.mxu2 %v37_v3  ;;  %v175_v21 = vld [vmem:[%s535_s3] sm:$0xff] }
   0x9   :  { %355 = vmatmul.msk.f32.vlgmr.msra.gmra.mxu0 %vm45_vm0, %v21_v4  ;;  %363 = vmatmul.msk.f32.vlgmr.msra.gmra.mxu2 %vm45_vm0, %v29_v5  ;;  %v394_v22 = vld [vmem:[%s534_s2] ss:$0 sm:$0xff] }
   0xa   :  { %371 = vmatpush.msk.msra.mxu1 %vm228_vm1, %v176_v20  ;;  %392 = vmatpush.msk.msra.mxu3 %vm228_vm1, %v176_v20 }
   0xc   :  { %247 = vmatpush.msra.mxu1 %v175_v21  ;;  %393 = vmatpush.msra.mxu3 %v175_v21 }
  0x11   :  { %356 = vmatmul.msk.f32.gmra.mxu0 %vm45_vm0, %v22_v6  ;;  %364 = vmatmul.msk.f32.gmra.mxu2 %vm45_vm0, %v30_v7  ;;  %v178_v7 = vstv %s536_s4 }
  0x19   :  { %357 = vmatmul.msk.f32.gmra.mxu0 %vm45_vm0, %v23_v8  ;;  %365 = vmatmul.msk.f32.gmra.mxu2 %vm45_vm0, %v31_v9 }
  0x21   :  { %358 = vmatmul.msk.f32.gmra.mxu0 %vm45_vm0, %v24_v10  ;;  %366 = vmatmul.msk.f32.gmra.mxu2 %vm45_vm0, %v32_v11 }
  0x29   :  { %359 = vmatmul.msk.f32.gmra.mxu0 %vm45_vm0, %v25_v12  ;;  %367 = vmatmul.msk.f32.gmra.mxu2 %vm45_vm0, %v33_v13 }
  0x31   :  { %360 = vmatmul.msk.f32.gmra.mxu0 %vm45_vm0, %v26_v14  ;;  %368 = vmatmul.msk.f32.gmra.mxu2 %vm45_vm0, %v34_v15 }
  0x39   :  { %361 = vmatmul.msk.f32.gmra.mxu0 %vm45_vm0, %v27_v16  ;;  %369 = vmatmul.msk.f32.gmra.mxu2 %vm45_vm0, %v35_v17 }
  0x41   :  { %362 = vmatmul.msk.f32.gmra.mxu0 %vm45_vm0, %v28_v18  ;;  %370 = vmatmul.msk.f32.gmra.mxu2 %vm45_vm0, %v36_v19 }
  0x86   :  { %v111_v23 = vpop.f32.mrf.mxu0 }
  0x87   :  { %v112_v24 = vadd.f32 %v394_v22, %v111_v23 }
  0x89   :  { %v159_v25 = vmax.f32 %v112_v24, 0.0 }
  0x8b   :  { %372 = vmatmul.msk.f32.vlgmr.msra.gmra.mxu1 %vm179_vm2, %v159_v25 }
  0x8c   :  { %v135_v26 = vpop.f32.mrf.mxu2 }
  0x8d   :  { %v136_v3 = vadd.f32 %v394_v22, %v135_v26 }
  0x8e   :  { %v114_v27 = vpop.f32.mrf.mxu0 }
  0x8f   :  { %v115_v28 = vadd.f32 %v394_v22, %v114_v27  ;;  %v167_v6 = vmax.f32 %v136_v3, 0.0 }
  0x91   :  { %v160_v29 = vmax.f32 %v115_v28, 0.0 }
  0x93   :  { %373 = vmatmul.msk.f32.gmra.mxu1 %vm179_vm2, %v160_v29 }
  0x94   :  { %v138_v30 = vpop.f32.mrf.mxu2 }
  0x95   :  { %v139_v31 = vadd.f32 %v394_v22, %v138_v30 }
  0x96   :  { %v117_v32 = vpop.f32.mrf.mxu0 }
  0x97   :  { %v168_v33 = vmax.f32 %v139_v31, 0.0  ;;  %v118_v34 = vadd.f32 %v394_v22, %v117_v32 }
  0x99   :  { %v161_v35 = vmax.f32 %v118_v34, 0.0  ;;  %381 = vmatmul.msk.f32.vlgmr.msra.gmra.mxu3 %vm179_vm2, %v168_v33 }
  0x9b   :  { %374 = vmatmul.msk.f32.gmra.mxu1 %vm179_vm2, %v161_v35 }
  0x9c   :  { %v141_v36 = vpop.f32.mrf.mxu2 }
  0x9d   :  { %v142_v37 = vadd.f32 %v394_v22, %v141_v36 }
  0x9e   :  { %v120_v38 = vpop.f32.mrf.mxu0 }
  0x9f   :  { %v169_v39 = vmax.f32 %v142_v37, 0.0  ;;  %v121_v40 = vadd.f32 %v394_v22, %v120_v38 }
  0xa1   :  { %v162_v41 = vmax.f32 %v121_v40, 0.0  ;;  %382 = vmatmul.msk.f32.gmra.mxu3 %vm179_vm2, %v169_v39 }
  0xa3   :  { %375 = vmatmul.msk.f32.gmra.mxu1 %vm179_vm2, %v162_v41 }
  0xa4   :  { %v144_v42 = vpop.f32.mrf.mxu2 }
  0xa5   :  { %v145_v43 = vadd.f32 %v394_v22, %v144_v42 }
  0xa6   :  { %v123_v44 = vpop.f32.mrf.mxu0 }
  0xa7   :  { %v170_v45 = vmax.f32 %v145_v43, 0.0  ;;  %v124_v46 = vadd.f32 %v394_v22, %v123_v44 }
  0xa9   :  { %v163_v47 = vmax.f32 %v124_v46, 0.0  ;;  %383 = vmatmul.msk.f32.gmra.mxu3 %vm179_vm2, %v170_v45 }
  0xab   :  { %376 = vmatmul.msk.f32.gmra.mxu1 %vm179_vm2, %v163_v47 }
  0xac   :  { %v147_v48 = vpop.f32.mrf.mxu2 }
  0xad   :  { %v148_v49 = vadd.f32 %v394_v22, %v147_v48 }
  0xae   :  { %v126_v50 = vpop.f32.mrf.mxu0 }
  0xaf   :  { %v171_v51 = vmax.f32 %v148_v49, 0.0  ;;  %v127_v52 = vadd.f32 %v394_v22, %v126_v50 }
  0xb1   :  { %v164_v53 = vmax.f32 %v127_v52, 0.0  ;;  %384 = vmatmul.msk.f32.gmra.mxu3 %vm179_vm2, %v171_v51 }
  0xb3   :  { %377 = vmatmul.msk.f32.gmra.mxu1 %vm179_vm2, %v164_v53 }
  0xb4   :  { %v150_v54 = vpop.f32.mrf.mxu2 }
  0xb5   :  { %v151_v55 = vadd.f32 %v394_v22, %v150_v54 }
  0xb6   :  { %v129_v56 = vpop.f32.mrf.mxu0 }
  0xb7   :  { %v172_v57 = vmax.f32 %v151_v55, 0.0  ;;  %v130_v58 = vadd.f32 %v394_v22, %v129_v56 }
  0xb9   :  { %v165_v59 = vmax.f32 %v130_v58, 0.0  ;;  %385 = vmatmul.msk.f32.gmra.mxu3 %vm179_vm2, %v172_v57 }
  0xbb   :  { %378 = vmatmul.msk.f32.gmra.mxu1 %vm179_vm2, %v165_v59 }
  0xbc   :  { %v153_v60 = vpop.f32.mrf.mxu2 }
  0xbd   :  { %v154_v61 = vadd.f32 %v394_v22, %v153_v60 }
  0xbe   :  { %v132_v62 = vpop.f32.mrf.mxu0 }
  0xbf   :  { %v173_v63 = vmax.f32 %v154_v61, 0.0  ;;  %v133_v0 = vadd.f32 %v394_v22, %v132_v62 }
  0xc1   :  { %v166_v1 = vmax.f32 %v133_v0, 0.0  ;;  %386 = vmatmul.msk.f32.gmra.mxu3 %vm179_vm2, %v173_v63 }
  0xc3   :  { %379 = vmatmul.msk.f32.gmra.mxu1 %vm179_vm2, %v166_v1 }
  0xc4   :  { %v156_v2 = vpop.f32.mrf.mxu2 }
  0xc5   :  { %v157_v4 = vadd.f32 %v394_v22, %v156_v2 }
  0xc7   :  { %v174_v5 = vmax.f32 %v157_v4, 0.0 }
  0xc9   :  { %387 = vmatmul.msk.f32.gmra.mxu3 %vm179_vm2, %v174_v5 }
  0xcb   :  { %380 = vmatmul.msk.f32.gmra.mxu1 %vm179_vm2, %v167_v6 }
 0x108   :  { %v249_v8 = vpop.f32.mrf.mxu1 }
 0x109   :  { %v250_v9 = vadd.f32 %v249_v8, %v178_v7 }
 0x10b   :  { %298 = vst.msk [vmem:[#allocation3] sm:$0xff] %vm297_vm3, %v250_v9 }
 0x110   :  { %v252_v10 = vpop.f32.mrf.mxu1 }
 0x112   :  { %v344_v11 = vld [vmem:[#allocation3] sm:$0xff] }
 0x113   :  { %345 = vst [vmem:[%s537_s5] sm:$0xff] %v344_v11 }
 0x118   :  { %v255_v12 = vpop.f32.mrf.mxu1 }
 0x11c   :  { %v276_v13 = vpop.f32.mrf.mxu3 }
 0x120   :  { %v258_v14 = vpop.f32.mrf.mxu1 }
 0x124   :  { %v279_v15 = vpop.f32.mrf.mxu3 }
 0x128   :  { %v261_v16 = vpop.f32.mrf.mxu1 }
 0x12c   :  { %v282_v17 = vpop.f32.mrf.mxu3 }
 0x130   :  { %v264_v18 = vpop.f32.mrf.mxu1 }
 0x134   :  { %v285_v19 = vpop.f32.mrf.mxu3 }
 0x138   :  { %v267_v20 = vpop.f32.mrf.mxu1 }
 0x13c   :  { %v288_v21 = vpop.f32.mrf.mxu3 }
 0x140   :  { %v270_v22 = vpop.f32.mrf.mxu1 }
 0x144   :  { %v291_v23 = vpop.f32.mrf.mxu3 }
 0x148   :  { %v273_v24 = vpop.f32.mrf.mxu1 }
 0x14c   :  { %v294_v25 = vpop.f32.mrf.mxu3 }

</bundles_post_ra>
